<compile_context>
chip_gen: v6e
topology: v6e:2x2x1
jax: 0.10.0
libtpu: 0.0.40
codegen_flags: <defaults>
</compile_context>

<pallas_src>
import functools

import jax
import jax.numpy as jnp
from jax.experimental import pallas as pl
from jax.experimental.pallas import tpu as pltpu


LANE = 128          # vreg lane width / MXU-native feature width
TILE_SUBLANE = 16   # batch-tile granularity (bf16-pack friendly; /8 safe for f32)


def _round_up(x, m):
    return (x + m - 1) // m * m


def _cdiv(a, b):
    return -(-a // b)


def _leaky_relu(x, slope):
    if 0.0 <= slope <= 1.0:
        return jnp.maximum(x, slope * x)       # 1 mul + 1 max
    return jnp.where(x >= 0, x, slope * x)     # general fallback


# --------------------------------------------------------------------------
# Kernel
# --------------------------------------------------------------------------
def make_vae_kernel(num_hidden, latent_pad, slope):
    """Fused VAE forward; one batch tile per grid step.

    ref layout:
      x, eps,
      encoder: (W, b) * num_hidden              # W bf16, b f32
      fused fc_mean|fc_logvar: (W, b)           # (H, 2*Lp) bf16, (1, 2*Lp) f32
      decoder: (W, b) * (num_hidden + 1)
      outputs: xr, ml   (ml = mean | logvar concatenated along lanes)
    """

    def kernel(*refs):
        it = iter(refs)
        x_ref = next(it)
        eps_ref = next(it)
        enc = [(next(it), next(it)) for _ in range(num_hidden)]
        wml_ref, bml_ref = next(it), next(it)
        dec = [(next(it), next(it)) for _ in range(num_hidden + 1)]
        xr_ref, ml_ref = next(it), next(it)

        # ---- encode ----  (bf16 matmul inputs, f32 accumulate / bias / act)
        h = x_ref[...]
        for w_ref, b_ref in enc:
            h = jnp.dot(h.astype(w_ref.dtype), w_ref[...],
                        preferred_element_type=jnp.float32)
            h = _leaky_relu(h + b_ref[...], slope)

        # fused mean | logvar: one lane-dense matmul instead of two narrow ones
        ml = jnp.dot(h.astype(wml_ref.dtype), wml_ref[...],
                     preferred_element_type=jnp.float32)
        ml = ml + bml_ref[...]
        # Store the slab NOW so its live range does not span the decoder loop.
        ml_ref[...] = ml.astype(ml_ref.dtype)

        mean = ml[:, :latent_pad]
        logvar = ml[:, latent_pad:]

        # ---- reparameterize (f32) ----
        z = mean + eps_ref[...] * jnp.exp(0.5 * logvar)

        # ---- decode ----
        d = z
        for i, (w_ref, b_ref) in enumerate(dec):
            d = jnp.dot(d.astype(w_ref.dtype), w_ref[...],
                        preferred_element_type=jnp.float32)
            d = d + b_ref[...]
            if i < len(dec) - 1:               # last decoder layer: no activation
                d = _leaky_relu(d, slope)

        xr_ref[...] = d.astype(xr_ref.dtype)

    return kernel


# --------------------------------------------------------------------------
# Parameter init / one-time preparation
# --------------------------------------------------------------------------
def init_vae_params(key, input_dim, hidden_dims, latent_dim):
    """Deterministic parameter init (PyTorch-Linear-style uniform bounds).

    Weights stored as (in_features, out_features); biases as (1, out)."""
    params = {"encoder": [], "decoder": []}

    def linear_init(k, fan_in, fan_out):
        kw, kb = jax.random.split(k)
        bound = 1.0 / jnp.sqrt(fan_in)
        w = jax.random.uniform(kw, (fan_in, fan_out), jnp.float32, -bound, bound)
        b = jax.random.uniform(kb, (1, fan_out), jnp.float32, -bound, bound)
        return w, b

    keys = jax.random.split(key, 2 * len(hidden_dims) + 3)
    ki = iter(keys)

    in_dim = input_dim
    for h in hidden_dims:
        params["encoder"].append(linear_init(next(ki), in_dim, h))
        in_dim = h
    params["fc_mean"] = linear_init(next(ki), hidden_dims[-1], latent_dim)
    params["fc_logvar"] = linear_init(next(ki), hidden_dims[-1], latent_dim)
    in_dim = latent_dim
    for h in reversed(hidden_dims):
        params["decoder"].append(linear_init(next(ki), in_dim, h))
        in_dim = h
    params["decoder"].append(linear_init(next(ki), hidden_dims[0], input_dim))
    return params


def _pad2(a, rows, cols):
    r, c = a.shape
    return jnp.pad(a, ((0, rows - r), (0, cols - c)))


def _pad_linear(w, b, weight_dtype):
    di = _round_up(w.shape[0], LANE)
    do = _round_up(w.shape[1], LANE)
    return (_pad2(w, di, do).astype(weight_dtype),
            _pad2(b, 1, do).astype(jnp.float32))


def prepare_params(params, weight_dtype=jnp.bfloat16):
    """One-time (outside the jitted forward): pad every linear to 128-lane
    multiples, fuse fc_mean|fc_logvar along the lane axis, cast weights to
    bf16 (biases stay f32).  Padded lanes carry exact zeros through the whole
    network (zero weight cols/rows, zero bias, LeakyReLU(0)=0)."""
    flat = []
    for w, b in params["encoder"]:
        flat += list(_pad_linear(w, b, weight_dtype))
    wm_p, bm_p = _pad_linear(*params["fc_mean"], weight_dtype)
    wl_p, bl_p = _pad_linear(*params["fc_logvar"], weight_dtype)
    flat += [jnp.concatenate([wm_p, wl_p], axis=1),
             jnp.concatenate([bm_p, bl_p], axis=1)]
    for w, b in params["decoder"]:
        flat += list(_pad_linear(w, b, weight_dtype))
    return tuple(jax.device_put(p) for p in flat)


# --------------------------------------------------------------------------
# Forward wrapper
# --------------------------------------------------------------------------
def _resident_spec(shape):
    # Weights/biases never change across batch tiles: keep them resident in
    # VMEM and single-buffered (double-buffering a constant block just doubles
    # its VMEM cost).
    buffered = getattr(pl, "Buffered", None)
    if buffered is not None:
        try:
            return pl.BlockSpec(shape, lambda i: (0, 0), pipeline_mode=buffered(1))
        except TypeError:
            pass
    return pl.BlockSpec(shape, lambda i: (0, 0))


@functools.partial(jax.jit, static_argnames=("slope", "block_batch"))
def vae_forward(x, eps, flat_params, *, slope=0.5, block_batch=512):
    batch, input_dim = x.shape
    latent_dim = eps.shape[1]
    num_hidden = (len(flat_params) - 4) // 4

    dp = flat_params[0].shape[0]                    # padded input dim
    lp = flat_params[2 * num_hidden].shape[1] // 2  # padded latent dim
    assert dp == _round_up(input_dim, LANE)
    assert lp >= latent_dim

    # ---- batch tiling: balanced tiles, >= 2 (even) grid steps when possible ----
    bb = max(TILE_SUBLANE, _round_up(block_batch, TILE_SUBLANE))
    num_tiles = _cdiv(batch, bb)
    if num_tiles == 1 and batch > TILE_SUBLANE:
        num_tiles = 2                   # keep both v7x TensorCores busy
    if num_tiles > 1 and num_tiles % 2 == 1:
        num_tiles += 1                  # even step count -> balanced cores
    tb = _round_up(_cdiv(batch, num_tiles), TILE_SUBLANE)
    bp = tb * num_tiles
    grid = (num_tiles,)

    # ---- pad inputs (zeros in padded lanes/rows) ----
    xp = jnp.pad(x.astype(jnp.float32), ((0, bp - batch), (0, dp - input_dim)))
    epsp = jnp.pad(eps.astype(jnp.float32),
                   ((0, bp - batch), (0, lp - latent_dim)))

    # ---- specs ----
    in_specs = [pl.BlockSpec((tb, dp), lambda i: (i, 0)),
                pl.BlockSpec((tb, lp), lambda i: (i, 0))]
    for p in flat_params:
        in_specs.append(_resident_spec(p.shape))

    out_shape = (
        jax.ShapeDtypeStruct((bp, dp), jnp.float32),       # xr (padded)
        jax.ShapeDtypeStruct((bp, 2 * lp), jnp.float32),   # mean | logvar
    )
    out_specs = (
        pl.BlockSpec((tb, dp), lambda i: (i, 0)),
        pl.BlockSpec((tb, 2 * lp), lambda i: (i, 0)),
    )

    # ---- VMEM budget from the actual footprint ----
    param_bytes = sum(int(p.size) * p.dtype.itemsize for p in flat_params)
    tile_bytes = 4 * tb * (dp + lp + dp + 2 * lp)     # f32 x/eps/xr/ml tiles
    max_feat = max(int(p.shape[-1]) for p in flat_params)
    act_bytes = 4 * 4 * tb * max_feat                 # activation scratch headroom
    footprint = param_bytes + 2 * tile_bytes + act_bytes
    try:
        vmem_cap = int(pltpu.get_tpu_info().vmem_capacity_bytes)
    except Exception:
        vmem_cap = 64 * 1024 * 1024                   # conservative (v7x per-TC)
    vmem_limit = min(max(footprint + (8 << 20), 32 << 20), (vmem_cap * 3) // 4)

    # ---- advisory cost estimate ----
    weight_shapes = [p.shape for p in flat_params if p.shape[0] > 1]
    flops = 2 * bp * sum(s[0] * s[1] for s in weight_shapes)
    io_bytes = param_bytes + 4 * bp * (dp + lp + dp + 2 * lp)
    cost = pl.CostEstimate(flops=int(flops),
                           transcendentals=int(bp * lp),   # exp in reparameterize
                           bytes_accessed=int(io_bytes))

    xr_p, ml_p = pl.pallas_call(
        make_vae_kernel(num_hidden, lp, slope),
        out_shape=out_shape,
        grid=grid,
        in_specs=in_specs,
        out_specs=out_specs,
        compiler_params=pltpu.CompilerParams(
            dimension_semantics=("parallel",),
            vmem_limit_bytes=int(vmem_limit)),
        cost_estimate=cost,
    )(xp, epsp, *flat_params)

    xr = xr_p[:batch, :input_dim]
    mean = ml_p[:batch, :latent_dim]
    logvar = ml_p[:batch, lp:lp + latent_dim]
    return xr, mean, logvar


# --------------------------------------------------------------------------
# Pure-JAX reference (full f32) for sanity checking
# --------------------------------------------------------------------------
def vae_forward_ref(x, eps, params, slope=0.5):
    h = x
    for w, b in params["encoder"]:
        a = h @ w + b
        h = jnp.where(a >= 0, a, slope * a)
    mean = h @ params["fc_mean"][0] + params["fc_mean"][1]
    logvar = h @ params["fc_logvar"][0] + params["fc_logvar"][1]
    z = mean + eps * jnp.exp(0.5 * logvar)
    d = z
    dec = params["decoder"]
    for i, (w, b) in enumerate(dec):
        d = d @ w + b
        if i < len(dec) - 1:
            d = jnp.where(d >= 0, d, slope * d)
    return d, mean, logvar


if __name__ == "__main__":
    # Small shapes consistent with the module: a fully-connected VAE.
    # batch=20 with block_batch=8 exercises multi-tile grid + batch padding.
    batch = 20
    input_dim = 16
    hidden_dims = (32, 16)
    latent_dim = 8
    slope = 0.5

    key = jax.random.PRNGKey(0)
    k_params, k_x, k_eps = jax.random.split(key, 3)

    params = init_vae_params(k_params, input_dim, hidden_dims, latent_dim)
    prepared = prepare_params(params)                       # one-time pad/fuse/bf16
    x = jax.random.normal(k_x, (batch, input_dim), jnp.float32)
    eps = jax.random.normal(k_eps, (batch, latent_dim), jnp.float32)

    xr, mean, logvar = vae_forward(x, eps, prepared, slope=slope, block_batch=8)
    jax.block_until_ready((xr, mean, logvar))

    # Correctness check against a full-f32 reference; tolerance loosened to
    # account for bf16 matmul inputs (accumulation stays f32).
    xr_ref, mean_ref, logvar_ref = vae_forward_ref(x, eps, params, slope)
    assert jnp.allclose(xr, xr_ref, atol=2e-2, rtol=2e-2)
    assert jnp.allclose(mean, mean_ref, atol=2e-2, rtol=2e-2)
    assert jnp.allclose(logvar, logvar_ref, atol=2e-2, rtol=2e-2)

    print("KERNEL_OK")
</pallas_src>

<mosaic_0001>
module attributes {stable_mosaic.version = 11 : i64} {
  func.func @kernel(%arg0: i32, %arg1: memref<16x128xf32, #tpu.memory_space<vmem>>, %arg2: memref<16x128xf32, #tpu.memory_space<vmem>>, %arg3: memref<128x128xbf16, #tpu.memory_space<vmem>>, %arg4: memref<1x128xf32, #tpu.memory_space<vmem>>, %arg5: memref<128x128xbf16, #tpu.memory_space<vmem>>, %arg6: memref<1x128xf32, #tpu.memory_space<vmem>>, %arg7: memref<128x256xbf16, #tpu.memory_space<vmem>>, %arg8: memref<1x256xf32, #tpu.memory_space<vmem>>, %arg9: memref<128x128xbf16, #tpu.memory_space<vmem>>, %arg10: memref<1x128xf32, #tpu.memory_space<vmem>>, %arg11: memref<128x128xbf16, #tpu.memory_space<vmem>>, %arg12: memref<1x128xf32, #tpu.memory_space<vmem>>, %arg13: memref<128x128xbf16, #tpu.memory_space<vmem>>, %arg14: memref<1x128xf32, #tpu.memory_space<vmem>>, %arg15: memref<16x128xf32, #tpu.memory_space<vmem>>, %arg16: memref<16x256xf32, #tpu.memory_space<vmem>>) attributes {dimension_semantics = [#tpu.dimension_semantics<parallel>], iteration_bounds = array<i64: 2>, scalar_prefetch = 0 : i64, scratch_operands = 0 : i64, tpu.core_type = #tpu.core_type<tc>, window_params = [{transform_indices = @transform_0, window_bounds = array<i64: 16, 128>}, {transform_indices = @transform_1, window_bounds = array<i64: 16, 128>}, {pipeline_mode = #tpu.pipeline_mode<synchronous>, transform_indices = @transform_2, window_bounds = array<i64: 128, 128>}, {pipeline_mode = #tpu.pipeline_mode<synchronous>, transform_indices = @transform_3, window_bounds = array<i64: 1, 128>}, {pipeline_mode = #tpu.pipeline_mode<synchronous>, transform_indices = @transform_4, window_bounds = array<i64: 128, 128>}, {pipeline_mode = #tpu.pipeline_mode<synchronous>, transform_indices = @transform_5, window_bounds = array<i64: 1, 128>}, {pipeline_mode = #tpu.pipeline_mode<synchronous>, transform_indices = @transform_6, window_bounds = array<i64: 128, 256>}, {pipeline_mode = #tpu.pipeline_mode<synchronous>, transform_indices = @transform_7, window_bounds = array<i64: 1, 256>}, {pipeline_mode = #tpu.pipeline_mode<synchronous>, transform_indices = @transform_8, window_bounds = array<i64: 128, 128>}, {pipeline_mode = #tpu.pipeline_mode<synchronous>, transform_indices = @transform_9, window_bounds = array<i64: 1, 128>}, {pipeline_mode = #tpu.pipeline_mode<synchronous>, transform_indices = @transform_10, window_bounds = array<i64: 128, 128>}, {pipeline_mode = #tpu.pipeline_mode<synchronous>, transform_indices = @transform_11, window_bounds = array<i64: 1, 128>}, {pipeline_mode = #tpu.pipeline_mode<synchronous>, transform_indices = @transform_12, window_bounds = array<i64: 128, 128>}, {pipeline_mode = #tpu.pipeline_mode<synchronous>, transform_indices = @transform_13, window_bounds = array<i64: 1, 128>}, {transform_indices = @transform_14, window_bounds = array<i64: 16, 128>}, {transform_indices = @transform_15, window_bounds = array<i64: 16, 256>}]} {
    %c0 = arith.constant 0 : index
    %c0_0 = arith.constant 0 : index
    %0 = vector.load %arg1[%c0, %c0_0] : memref<16x128xf32, #tpu.memory_space<vmem>>, vector<16x128xf32>
    %1 = arith.truncf %0 : vector<16x128xf32> to vector<16x128xbf16>
    %c0_1 = arith.constant 0 : index
    %c0_2 = arith.constant 0 : index
    %2 = vector.load %arg3[%c0_1, %c0_2] : memref<128x128xbf16, #tpu.memory_space<vmem>>, vector<128x128xbf16>
    %cst = arith.constant dense<0.000000e+00> : vector<16x128xf32>
    %3 = tpu.matmul %1, %2, %cst {dimension_numbers = #tpu.dot_dimension_numbers<[1], [0], [0], [1], [0, 0, 1, 1], [], []>} : vector<16x128xbf16>, vector<128x128xbf16>, vector<16x128xf32> -> vector<16x128xf32>
    %c0_3 = arith.constant 0 : index
    %c0_4 = arith.constant 0 : index
    %4 = vector.load %arg4[%c0_3, %c0_4] : memref<1x128xf32, #tpu.memory_space<vmem>>, vector<1x128xf32>
    %5 = vector.broadcast %4 : vector<1x128xf32> to vector<16x128xf32>
    %6 = arith.addf %3, %5 : vector<16x128xf32>
    %cst_5 = arith.constant 5.000000e-01 : f32
    %7 = vector.broadcast %cst_5 : f32 to vector<16x128xf32>
    %8 = arith.mulf %7, %6 : vector<16x128xf32>
    %9 = arith.maximumf %6, %8 : vector<16x128xf32>
    %10 = arith.truncf %9 : vector<16x128xf32> to vector<16x128xbf16>
    %c0_6 = arith.constant 0 : index
    %c0_7 = arith.constant 0 : index
    %11 = vector.load %arg5[%c0_6, %c0_7] : memref<128x128xbf16, #tpu.memory_space<vmem>>, vector<128x128xbf16>
    %cst_8 = arith.constant dense<0.000000e+00> : vector<16x128xf32>
    %12 = tpu.matmul %10, %11, %cst_8 {dimension_numbers = #tpu.dot_dimension_numbers<[1], [0], [0], [1], [0, 0, 1, 1], [], []>} : vector<16x128xbf16>, vector<128x128xbf16>, vector<16x128xf32> -> vector<16x128xf32>
    %c0_9 = arith.constant 0 : index
    %c0_10 = arith.constant 0 : index
    %13 = vector.load %arg6[%c0_9, %c0_10] : memref<1x128xf32, #tpu.memory_space<vmem>>, vector<1x128xf32>
    %14 = vector.broadcast %13 : vector<1x128xf32> to vector<16x128xf32>
    %15 = arith.addf %12, %14 : vector<16x128xf32>
    %cst_11 = arith.constant 5.000000e-01 : f32
    %16 = vector.broadcast %cst_11 : f32 to vector<16x128xf32>
    %17 = arith.mulf %16, %15 : vector<16x128xf32>
    %18 = arith.maximumf %15, %17 : vector<16x128xf32>
    %19 = arith.truncf %18 : vector<16x128xf32> to vector<16x128xbf16>
    %c0_12 = arith.constant 0 : index
    %c0_13 = arith.constant 0 : index
    %20 = vector.load %arg7[%c0_12, %c0_13] : memref<128x256xbf16, #tpu.memory_space<vmem>>, vector<128x256xbf16>
    %cst_14 = arith.constant dense<0.000000e+00> : vector<16x256xf32>
    %21 = tpu.matmul %19, %20, %cst_14 {dimension_numbers = #tpu.dot_dimension_numbers<[1], [0], [0], [1], [0, 0, 1, 1], [], []>} : vector<16x128xbf16>, vector<128x256xbf16>, vector<16x256xf32> -> vector<16x256xf32>
    %c0_15 = arith.constant 0 : index
    %c0_16 = arith.constant 0 : index
    %22 = vector.load %arg8[%c0_15, %c0_16] : memref<1x256xf32, #tpu.memory_space<vmem>>, vector<1x256xf32>
    %23 = vector.broadcast %22 : vector<1x256xf32> to vector<16x256xf32>
    %24 = arith.addf %21, %23 : vector<16x256xf32>
    %c0_17 = arith.constant 0 : index
    %c0_18 = arith.constant 0 : index
    %25 = vector.load %arg16[%c0_17, %c0_18] : memref<16x256xf32, #tpu.memory_space<vmem>>, vector<16x256xf32>
    tpu.vector_store %arg16[%c0_17, %c0_18], %24 {strides = array<i32>} : memref<16x256xf32, #tpu.memory_space<vmem>>, vector<16x256xf32>,
    %26 = vector.extract_strided_slice %24 {offsets = [0, 0], sizes = [16, 128], strides = [1, 1]} : vector<16x256xf32> to vector<16x128xf32>
    %27 = vector.extract_strided_slice %24 {offsets = [0, 128], sizes = [16, 128], strides = [1, 1]} : vector<16x256xf32> to vector<16x128xf32>
    %c0_19 = arith.constant 0 : index
    %c0_20 = arith.constant 0 : index
    %28 = vector.load %arg2[%c0_19, %c0_20] : memref<16x128xf32, #tpu.memory_space<vmem>>, vector<16x128xf32>
    %cst_21 = arith.constant 5.000000e-01 : f32
    %29 = vector.broadcast %cst_21 : f32 to vector<16x128xf32>
    %30 = arith.mulf %29, %27 : vector<16x128xf32>
    %31 = math.exp %30 : vector<16x128xf32>
    %32 = arith.mulf %28, %31 : vector<16x128xf32>
    %33 = arith.addf %26, %32 : vector<16x128xf32>
    %34 = arith.truncf %33 : vector<16x128xf32> to vector<16x128xbf16>
    %c0_22 = arith.constant 0 : index
    %c0_23 = arith.constant 0 : index
    %35 = vector.load %arg9[%c0_22, %c0_23] : memref<128x128xbf16, #tpu.memory_space<vmem>>, vector<128x128xbf16>
    %cst_24 = arith.constant dense<0.000000e+00> : vector<16x128xf32>
    %36 = tpu.matmul %34, %35, %cst_24 {dimension_numbers = #tpu.dot_dimension_numbers<[1], [0], [0], [1], [0, 0, 1, 1], [], []>} : vector<16x128xbf16>, vector<128x128xbf16>, vector<16x128xf32> -> vector<16x128xf32>
    %c0_25 = arith.constant 0 : index
    %c0_26 = arith.constant 0 : index
    %37 = vector.load %arg10[%c0_25, %c0_26] : memref<1x128xf32, #tpu.memory_space<vmem>>, vector<1x128xf32>
    %38 = vector.broadcast %37 : vector<1x128xf32> to vector<16x128xf32>
    %39 = arith.addf %36, %38 : vector<16x128xf32>
    %cst_27 = arith.constant 5.000000e-01 : f32
    %40 = vector.broadcast %cst_27 : f32 to vector<16x128xf32>
    %41 = arith.mulf %40, %39 : vector<16x128xf32>
    %42 = arith.maximumf %39, %41 : vector<16x128xf32>
    %43 = arith.truncf %42 : vector<16x128xf32> to vector<16x128xbf16>
    %c0_28 = arith.constant 0 : index
    %c0_29 = arith.constant 0 : index
    %44 = vector.load %arg11[%c0_28, %c0_29] : memref<128x128xbf16, #tpu.memory_space<vmem>>, vector<128x128xbf16>
    %cst_30 = arith.constant dense<0.000000e+00> : vector<16x128xf32>
    %45 = tpu.matmul %43, %44, %cst_30 {dimension_numbers = #tpu.dot_dimension_numbers<[1], [0], [0], [1], [0, 0, 1, 1], [], []>} : vector<16x128xbf16>, vector<128x128xbf16>, vector<16x128xf32> -> vector<16x128xf32>
    %c0_31 = arith.constant 0 : index
    %c0_32 = arith.constant 0 : index
    %46 = vector.load %arg12[%c0_31, %c0_32] : memref<1x128xf32, #tpu.memory_space<vmem>>, vector<1x128xf32>
    %47 = vector.broadcast %46 : vector<1x128xf32> to vector<16x128xf32>
    %48 = arith.addf %45, %47 : vector<16x128xf32>
    %cst_33 = arith.constant 5.000000e-01 : f32
    %49 = vector.broadcast %cst_33 : f32 to vector<16x128xf32>
    %50 = arith.mulf %49, %48 : vector<16x128xf32>
    %51 = arith.maximumf %48, %50 : vector<16x128xf32>
    %52 = arith.truncf %51 : vector<16x128xf32> to vector<16x128xbf16>
    %c0_34 = arith.constant 0 : index
    %c0_35 = arith.constant 0 : index
    %53 = vector.load %arg13[%c0_34, %c0_35] : memref<128x128xbf16, #tpu.memory_space<vmem>>, vector<128x128xbf16>
    %cst_36 = arith.constant dense<0.000000e+00> : vector<16x128xf32>
    %54 = tpu.matmul %52, %53, %cst_36 {dimension_numbers = #tpu.dot_dimension_numbers<[1], [0], [0], [1], [0, 0, 1, 1], [], []>} : vector<16x128xbf16>, vector<128x128xbf16>, vector<16x128xf32> -> vector<16x128xf32>
    %c0_37 = arith.constant 0 : index
    %c0_38 = arith.constant 0 : index
    %55 = vector.load %arg14[%c0_37, %c0_38] : memref<1x128xf32, #tpu.memory_space<vmem>>, vector<1x128xf32>
    %56 = vector.broadcast %55 : vector<1x128xf32> to vector<16x128xf32>
    %57 = arith.addf %54, %56 : vector<16x128xf32>
    %c0_39 = arith.constant 0 : index
    %c0_40 = arith.constant 0 : index
    %58 = vector.load %arg15[%c0_39, %c0_40] : memref<16x128xf32, #tpu.memory_space<vmem>>, vector<16x128xf32>
    tpu.vector_store %arg15[%c0_39, %c0_40], %57 {strides = array<i32>} : memref<16x128xf32, #tpu.memory_space<vmem>>, vector<16x128xf32>,
    return
  }
  func.func @transform_0(%arg0: i32) -> (i32, i32) {
    %c0_i32 = arith.constant 0 : i32
    %c0_i32_0 = arith.constant 0 : i32
    return %arg0, %c0_i32 : i32, i32
  }
  func.func @transform_1(%arg0: i32) -> (i32, i32) {
    %c0_i32 = arith.constant 0 : i32
    %c0_i32_0 = arith.constant 0 : i32
    return %arg0, %c0_i32 : i32, i32
  }
  func.func @transform_2(%arg0: i32) -> (i32, i32) {
    %c0_i32 = arith.constant 0 : i32
    %c0_i32_0 = arith.constant 0 : i32
    %c0_i32_1 = arith.constant 0 : i32
    return %c0_i32, %c0_i32_0 : i32, i32
  }
  func.func @transform_3(%arg0: i32) -> (i32, i32) {
    %c0_i32 = arith.constant 0 : i32
    %c0_i32_0 = arith.constant 0 : i32
    %c0_i32_1 = arith.constant 0 : i32
    return %c0_i32, %c0_i32_0 : i32, i32
  }
  func.func @transform_4(%arg0: i32) -> (i32, i32) {
    %c0_i32 = arith.constant 0 : i32
    %c0_i32_0 = arith.constant 0 : i32
    %c0_i32_1 = arith.constant 0 : i32
    return %c0_i32, %c0_i32_0 : i32, i32
  }
  func.func @transform_5(%arg0: i32) -> (i32, i32) {
    %c0_i32 = arith.constant 0 : i32
    %c0_i32_0 = arith.constant 0 : i32
    %c0_i32_1 = arith.constant 0 : i32
    return %c0_i32, %c0_i32_0 : i32, i32
  }
  func.func @transform_6(%arg0: i32) -> (i32, i32) {
    %c0_i32 = arith.constant 0 : i32
    %c0_i32_0 = arith.constant 0 : i32
    %c0_i32_1 = arith.constant 0 : i32
    return %c0_i32, %c0_i32_0 : i32, i32
  }
  func.func @transform_7(%arg0: i32) -> (i32, i32) {
    %c0_i32 = arith.constant 0 : i32
    %c0_i32_0 = arith.constant 0 : i32
    %c0_i32_1 = arith.constant 0 : i32
    return %c0_i32, %c0_i32_0 : i32, i32
  }
  func.func @transform_8(%arg0: i32) -> (i32, i32) {
    %c0_i32 = arith.constant 0 : i32
    %c0_i32_0 = arith.constant 0 : i32
    %c0_i32_1 = arith.constant 0 : i32
    return %c0_i32, %c0_i32_0 : i32, i32
  }
  func.func @transform_9(%arg0: i32) -> (i32, i32) {
    %c0_i32 = arith.constant 0 : i32
    %c0_i32_0 = arith.constant 0 : i32
    %c0_i32_1 = arith.constant 0 : i32
    return %c0_i32, %c0_i32_0 : i32, i32
  }
  func.func @transform_10(%arg0: i32) -> (i32, i32) {
    %c0_i32 = arith.constant 0 : i32
    %c0_i32_0 = arith.constant 0 : i32
    %c0_i32_1 = arith.constant 0 : i32
    return %c0_i32, %c0_i32_0 : i32, i32
  }
  func.func @transform_11(%arg0: i32) -> (i32, i32) {
    %c0_i32 = arith.constant 0 : i32
    %c0_i32_0 = arith.constant 0 : i32
    %c0_i32_1 = arith.constant 0 : i32
    return %c0_i32, %c0_i32_0 : i32, i32
  }
  func.func @transform_12(%arg0: i32) -> (i32, i32) {
    %c0_i32 = arith.constant 0 : i32
    %c0_i32_0 = arith.constant 0 : i32
    %c0_i32_1 = arith.constant 0 : i32
    return %c0_i32, %c0_i32_0 : i32, i32
  }
  func.func @transform_13(%arg0: i32) -> (i32, i32) {
    %c0_i32 = arith.constant 0 : i32
    %c0_i32_0 = arith.constant 0 : i32
    %c0_i32_1 = arith.constant 0 : i32
    return %c0_i32, %c0_i32_0 : i32, i32
  }
  func.func @transform_14(%arg0: i32) -> (i32, i32) {
    %c0_i32 = arith.constant 0 : i32
    %c0_i32_0 = arith.constant 0 : i32
    return %arg0, %c0_i32 : i32, i32
  }
  func.func @transform_15(%arg0: i32) -> (i32, i32) {
    %c0_i32 = arith.constant 0 : i32
    %c0_i32_0 = arith.constant 0 : i32
    return %arg0, %c0_i32 : i32, i32
  }
}

</mosaic_0001>

<bundles_post_ra>
// kernel: vae_forward.1
= control target key start
LH: loop header
LB: loop body
LE: loop exit
PB: predicated region body
PF: predicated region fallthrough
CT: control target
= control target key end

     0   :  { %21 = vsyncpa [#allocation3], 0  ;;  %s2329_s0 = inlined_call_operand.vmem [shape: f32[32,128], index: 0, kind: input, shape index: {}]   ;;  %s2330_s1 = inlined_call_operand.vmem [shape: f32[32,128], index: 1, kind: input, shape index: {}]   ;;  %s2331_s2 = inlined_call_operand.vmem [shape: bf16[128,128], index: 2, kind: input, shape index: {}]   ;;  %s2332_s3 = inlined_call_operand.vmem [shape: f32[1,128], index: 3, kind: input, shape index: {}]   ;;  %s2333_s4 = inlined_call_operand.hbm [shape: bf16[128,128], index: 4, kind: input, shape index: {}]   ;;  %s2334_s5 = inlined_call_operand.vmem [shape: f32[1,128], index: 5, kind: input, shape index: {}]   ;;  %s2335_s6 = inlined_call_operand.vmem [shape: bf16[128,256], index: 6, kind: input, shape index: {}]   ;;  %s2336_s7 = inlined_call_operand.vmem [shape: f32[1,256], index: 7, kind: input, shape index: {}]   ;;  %s2337_s8 = inlined_call_operand.hbm [shape: bf16[128,128], index: 8, kind: input, shape index: {}]   ;;  %s2338_s9 = inlined_call_operand.vmem [shape: f32[1,128], index: 9, kind: input, shape index: {}]   ;;  %s2339_s10 = inlined_call_operand.hbm [shape: bf16[128,128], index: 10, kind: input, shape index: {}]   ;;  %s2340_s11 = inlined_call_operand.vmem [shape: f32[1,128], index: 11, kind: input, shape index: {}]   ;;  %s2341_s12 = inlined_call_operand.hbm [shape: bf16[128,128], index: 12, kind: input, shape index: {}]   ;;  %s2342_s13 = inlined_call_operand.vmem [shape: f32[1,128], index: 13, kind: input, shape index: {}]   ;;  %s2343_s14 = inlined_call_operand.vmem [shape: f32[32,128], index: 14, kind: output, shape index: {0}]   ;;  %s2344_s15 = inlined_call_operand.vmem [shape: f32[32,256], index: 15, kind: output, shape index: {1}]  }
   0x1   :  { %22 = vsyncpa [#allocation5], 0 }
   0x2   :  { %23 = vsyncpa [#allocation8], 0  ;;  %s2060_s18 = smov 0  }
   0x3 LB: > { %s1494_s19 = sadd.s32 4294967295, %s1969_s18   ;;  %p1496_p0 = scmp.ge.s32.totalorder %s1969_s18, 1  ;;  %s1969_s18 = sphi %s2060_s18, %s29_s18  }
   0x4   : > { %p390_p1 = scmp.lt.s32.totalorder %s1969_s18, 3  ;;  %p2070_p2 = scmp.eq.s32.totalorder %s1494_s19, 0 }
   0x5   : > { %s1971_s22 = smov [#allocation4]   ;;  %s1972_s24 = smov [#allocation2]  }
   0x6   : > { %p2074_p3 = pnand %p1496_p0, %p390_p1  ;;  %s430_s23 = sshll.u32 %s1971_s22, 4  ;;  %s431_s23 = int_to_ptr.vmem [resolvable:$true] %s430_s23 }
   0x7   : > { %s408_s25 = sshll.u32 %s1972_s24, 4  ;;  %s1973_s27 = smov [#allocation6]   ;;  %s2080_s25 = int_to_ptr.vmem [resolvable:$true] %s408_s25 }
   0x8   : > { %p1741_p4 = pneg %p2074_p3  ;;  %s446_s28 = sshll.u32 %s1973_s27, 4  ;;  %s2088_s28 = int_to_ptr.vmem [resolvable:$true] %s446_s28 }
   0x9   : > { %s1974_s29 = smov [#allocation7]   ;;  %s1858_s16 = scalar_lea.vmem %s431_s23, 1024 }
   0xa   : > { %p2084_p5 = pnand %p2070_p2, %p1741_p4  ;;  %s2090_s30 = sshll.u32 %s1974_s29, 4  ;;  %s463_s30 = int_to_ptr.vmem [resolvable:$true] %s2090_s30 }
   0xb   : > { %p1859_p7 = scmp.ne.s32.totalorder %s431_s23, %s1858_s16  ;;  %p1866_p10 = scmp.lt.s32.totalorder %s431_s23, %s431_s23 }
   0xc   : > { %p1849_p6 = pneg %p2084_p5  ;;  %p1867_p11 = scmp.lt.s32.totalorder %s1858_s16, %s1858_s16 }
   0xe   : > { %p1861_p8 = pnand %p1859_p7, %p1849_p6  ;;  %p1868_p12 = por %p1867_p11, %p1866_p10 }
  0x10   : > { %p1862_p9 = pneg %p1861_p8 }
  0x12   : > { %p1869_p13 = pnand %p1868_p12, %p1862_p9 }
  0x14   : > { %1872 = shalt.err (!%p1869_p13)
}
  0x15   : > { %s1975_s17 = smov 64   ;;  %s1976_s22 = smov 4  }
  0x16   : > { %1747 = dma.hbm_to_vmem [thread:$0]  (!%p2084_p5), %s2337_s8, 1024, %s431_s23, [#allocation5], %s1975_s17, %s1975_s17, %s1976_s22  }
  0x17   : > { %s1884_s29 = scalar_lea.vmem %s2080_s25, 1024  ;;  %p1892_p7 = scmp.lt.s32.totalorder %s2080_s25, %s2080_s25 }
  0x18   : > { %p1885_p0 = scmp.ne.s32.totalorder %s2080_s25, %s1884_s29  ;;  %p1893_p8 = scmp.lt.s32.totalorder %s1884_s29, %s1884_s29 }
  0x1a   : > { %p1887_p1 = pnand %p1885_p0, %p1849_p6  ;;  %p1894_p9 = por %p1893_p8, %p1892_p7 }
  0x1c   : > { %p1888_p4 = pneg %p1887_p1 }
  0x1e   : > { %p1895_p10 = pnand %p1894_p9, %p1888_p4 }
  0x20   : > { %1898 = shalt.err (!%p1895_p10)
}
  0x21   : > { %1744 = dma.hbm_to_vmem [thread:$0]  (!%p2084_p5), %s2333_s4, 1024, %s2080_s25, [#allocation3], %s1975_s17, %s1975_s17, %s1976_s22  }
  0x22   : > { %s1910_s24 = scalar_lea.vmem %s2088_s28, 1024  ;;  %p1918_p0 = scmp.lt.s32.totalorder %s2088_s28, %s2088_s28 }
  0x23   : > { %p1911_p11 = scmp.ne.s32.totalorder %s2088_s28, %s1910_s24  ;;  %p1919_p1 = scmp.lt.s32.totalorder %s1910_s24, %s1910_s24 }
  0x25   : > { %p1913_p12 = pnand %p1911_p11, %p1849_p6  ;;  %p1920_p4 = por %p1919_p1, %p1918_p0 }
  0x27   : > { %p1914_p13 = pneg %p1913_p12 }
  0x29   : > { %p1921_p7 = pnand %p1920_p4, %p1914_p13 }
  0x2b   : > { %1924 = shalt.err (!%p1921_p7)
}
  0x2c   : > { %1750 = dma.hbm_to_vmem [thread:$0]  (!%p2084_p5), %s2339_s10, 1024, %s2088_s28, [#allocation5], %s1975_s17, %s1975_s17, %s1976_s22  }
  0x2d   : > { %s1936_s29 = scalar_lea.vmem %s463_s30, 1024  ;;  %p1944_p11 = scmp.lt.s32.totalorder %s463_s30, %s463_s30 }
  0x2e   : > { %p1937_p8 = scmp.ne.s32.totalorder %s463_s30, %s1936_s29  ;;  %p1945_p12 = scmp.lt.s32.totalorder %s1936_s29, %s1936_s29 }
  0x30   : > { %p1939_p9 = pnand %p1937_p8, %p1849_p6  ;;  %p1946_p13 = por %p1945_p12, %p1944_p11 }
  0x32   : > { %p1940_p10 = pneg %p1939_p9 }
  0x34   : > { %p1947_p0 = pnand %p1946_p13, %p1940_p10 }
  0x36   : > { %1950 = shalt.err (!%p1947_p0)
}
  0x37   : > { %1753 = dma.hbm_to_vmem [thread:$0]  (!%p2084_p5), %s2341_s12, 1024, %s463_s30, [#allocation8], %s1975_s17, %s1975_s17, %s1976_s22  }
  0x38   : > { %499 = sbr.rel (%p2074_p3) target bundleno = 1345 (0x541), region = 76 }
  0x3d   : > { %1956 = dma.done.wait (%p2070_p2), [#allocation3], 1024  }
  0x3e   : > { %1958 = vsyncadd (%p2070_p2), [#allocation3], 4294966272 }
  0x3f   : > { %1960 = dma.done.wait (%p2070_p2), [#allocation5], 2048  }
  0x40   : > { %1962 = vsyncadd (%p2070_p2), [#allocation5], 4294965248 }
  0x41   : > { %1964 = dma.done.wait (%p2070_p2), [#allocation8], 1024  }
  0x42   : > { %1966 = vsyncadd (%p2070_p2), [#allocation8], 4294966272  ;;  %v1977_v0 = vmov 0.0   ;;  %vm1978_vm0 = vmmov 0   ;;  %v1779_v1 = vld [vmem:[%s2331_s2 + $0x38] sm:$0xff]   ;;  %v1780_v2 = vld [vmem:[%s2331_s2 + $0x30] sm:$0xff]  }
  0x43   : > { %1625 = vmatprep.subr.bf16.mxu0 %v1977_v0  ;;  %1641 = vmatprep.mubr.msk.bf16.mxu0 %vm1978_vm0, %v1977_v0  ;;  %v1781_v3 = vld [vmem:[%s2331_s2 + $0x28] sm:$0xff]   ;;  %s1507_s22 = sshll.u32 %s1494_s19, 1  ;;  %v1782_v4 = vld [vmem:[%s2331_s2 + $0x20] sm:$0xff]   ;;  %v1787_v5 = vld [vmem:[#allocation2 + $0x38] sm:$0xff]   ;;  %v1979_v48 = vmov 0  }
  0x44   : > { %1645 = vmatprep.subr.bf16.mxu1 %v1977_v0  ;;  %1661 = vmatprep.mubr.msk.bf16.mxu1 %vm1978_vm0, %v1977_v0  ;;  %p571_p2 = scmp.lt.s32.totalorder %s1507_s22, 3  ;;  %v1788_v6 = vld [vmem:[#allocation2 + $0x30] sm:$0xff]   ;;  %v1783_v7 = vld [vmem:[%s2331_s2 + $0x18] sm:$0xff]   ;;  %v1789_v8 = vld [vmem:[#allocation2 + $0x28] sm:$0xff]  }
  0x45   : > { %1626 = vmatpush3.bf16.msra.mxu0 %v1779_v1  ;;  %1646 = vmatpush3.bf16.msra.mxu1 %v1787_v5  ;;  %v1784_v9 = vld [vmem:[%s2331_s2 + $0x10] sm:$0xff]   ;;  %v1790_v10 = vld [vmem:[#allocation2 + $0x20] sm:$0xff]   ;;  %v1785_v11 = vld [vmem:[%s2331_s2 + $0x8] sm:$0xff]  }
  0x46   : > { %1627 = vmatprep.subr.bf16.mxu0 %v1977_v0  ;;  %1647 = vmatprep.subr.bf16.mxu1 %v1977_v0  ;;  %s2349_s22 = smov (!%p571_p2, %s1507_s22), 3  ;;  %v1791_v12 = vld [vmem:[#allocation2 + $0x18] sm:$0xff]   ;;  %v1786_v13 = vld [vmem:[%s2331_s2] sm:$0xff]   ;;  %v1792_v17 = vld [vmem:[#allocation2 + $0x10] sm:$0xff]  }
  0x47   : > { %s2198_s23 = sshll.u32 %s2349_s22, 3  ;;  %v1793_v18 = vld [vmem:[#allocation2 + $0x8] sm:$0xff]   ;;  %v1794_v19 = vld [vmem:[#allocation2] sm:$0xff]   ;;  %v1795_v20 = vld [vmem:[%s2335_s6 + $0x70] ss:$8 sps:$4 sm:$0xff]   ;;  %s1579_s29 = sshll.u32 %s2349_s22, 4 }
  0x48   : > { %s574_s30 = scalar_lea.vmem %s2329_s0, %s2198_s23  ;;  %v1797_v21 = vld [vmem:[%s2335_s6 + $0x74] ss:$8 sps:$4 sm:$0xff]   ;;  %v1800_v22 = vld [vmem:[%s2335_s6 + $0x64] ss:$8 sps:$4 sm:$0xff]   ;;  %v1798_v23 = vld [vmem:[%s2335_s6 + $0x60] ss:$8 sps:$4 sm:$0xff]   ;;  %s593_s21 = scalar_lea.vmem %s2344_s15, %s1579_s29 }
  0x49   : > { %1628 = vmatpush3.bf16.msra.mxu0 %v1780_v2  ;;  %1648 = vmatpush3.bf16.msra.mxu1 %v1788_v6  ;;  %v596_v14 = vld [vmem:[%s574_s30] sm:$0xff]  ;;  %v597_v15 = vld [vmem:[%s574_s30 + $0x8] sm:$0xff]  ;;  %v1803_v24 = vld [vmem:[%s2335_s6 + $0x54] ss:$8 sps:$4 sm:$0xff]   ;;  %s580_s20 = scalar_lea.vmem %s2330_s1, %s2198_s23  ;;  %s586_s16 = scalar_lea.vmem %s2343_s14, %s2198_s23 }
  0x4a   : > { %1629 = vmatprep.subr.bf16.mxu0 %v1977_v0  ;;  %1649 = vmatprep.subr.bf16.mxu1 %v1977_v0  ;;  %v598_v16 = vpack.c.bf16 %v597_v15, %v596_v14  ;;  %v1801_v25 = vld [vmem:[%s2335_s6 + $0x50] ss:$8 sps:$4 sm:$0xff]   ;;  %v1806_v26 = vld [vmem:[%s2335_s6 + $0x44] ss:$8 sps:$4 sm:$0xff]   ;;  %v1804_v27 = vld [vmem:[%s2335_s6 + $0x40] ss:$8 sps:$4 sm:$0xff]  }
  0x4b   : > { %v1809_v28 = vld [vmem:[%s2335_s6 + $0x34] ss:$8 sps:$4 sm:$0xff]   ;;  %v1807_v29 = vld [vmem:[%s2335_s6 + $0x30] ss:$8 sps:$4 sm:$0xff]   ;;  %v1516_v30 = vld [vmem:[%s2332_s3] ss:$0 sm:$0xff] }
  0x4c   : > { %v1812_v42 = vld [vmem:[%s2335_s6 + $0x24] ss:$8 sps:$4 sm:$0xff]   ;;  %v1810_v43 = vld [vmem:[%s2335_s6 + $0x20] ss:$8 sps:$4 sm:$0xff]   ;;  %v1815_v44 = vld [vmem:[%s2335_s6 + $0x14] ss:$8 sps:$4 sm:$0xff]  }
  0x4d   : > { %1630 = vmatpush3.bf16.msra.mxu0 %v1781_v3  ;;  %1650 = vmatpush3.bf16.msra.mxu1 %v1789_v8  ;;  %v1813_v45 = vld [vmem:[%s2335_s6 + $0x10] ss:$8 sps:$4 sm:$0xff]   ;;  %v1818_v46 = vld [vmem:[%s2335_s6 + $0x4] ss:$8 sps:$4 sm:$0xff]   ;;  %v1816_v47 = vld [vmem:[%s2335_s6] ss:$8 sps:$4 sm:$0xff]  }
  0x4e   : > { %1631 = vmatprep.subr.bf16.mxu0 %v1977_v0  ;;  %1651 = vmatprep.subr.bf16.mxu1 %v1977_v0  ;;  %v1525_v49 = vld [vmem:[%s2334_s5] ss:$0 sm:$0xff]  ;;  %v1819_v61 = vld [vmem:[#allocation4 + $0x38] sm:$0xff]   ;;  %v1820_v62 = vld [vmem:[#allocation4 + $0x30] sm:$0xff]  }
  0x4f   : > { %v1821_v63 = vld [vmem:[#allocation4 + $0x28] sm:$0xff]   ;;  %v1822_v1 = vld [vmem:[#allocation4 + $0x20] sm:$0xff]   ;;  %v1823_v2 = vld [vmem:[#allocation4 + $0x18] sm:$0xff]  }
  0x50   : > { %v1824_v3 = vld [vmem:[#allocation4 + $0x10] sm:$0xff]   ;;  %v1826_v5 = vld [vmem:[#allocation4] sm:$0xff]   ;;  %v1827_v6 = vld [vmem:[#allocation6 + $0x38] sm:$0xff]  }
  0x51   : > { %1632 = vmatpush3.bf16.msra.mxu0 %v1782_v4  ;;  %1652 = vmatpush3.bf16.msra.mxu1 %v1790_v10  ;;  %v1825_v4 = vld [vmem:[#allocation4 + $0x8] sm:$0xff]   ;;  %v1831_v10 = vld [vmem:[#allocation6 + $0x18] sm:$0xff]   ;;  %v849_v14 = vld [vmem:[%s2336_s7] sm:$0x3] }
  0x52   : > { %1633 = vmatprep.subr.bf16.mxu0 %v1977_v0  ;;  %1653 = vmatprep.subr.bf16.mxu1 %v1977_v0  ;;  %v1829_v8 = vld [vmem:[#allocation6 + $0x28] sm:$0xff]  }
  0x55   : > { %1634 = vmatpush3.bf16.msra.mxu0 %v1783_v7  ;;  %1654 = vmatpush3.bf16.msra.mxu1 %v1791_v12  ;;  %v1828_v7 = vld [vmem:[#allocation6 + $0x30] sm:$0xff]  }
  0x56   : > { %1635 = vmatprep.subr.bf16.mxu0 %v1977_v0  ;;  %1655 = vmatprep.subr.bf16.mxu1 %v1977_v0 }
  0x59   : > { %1636 = vmatpush3.bf16.msra.mxu0 %v1784_v9  ;;  %1656 = vmatpush3.bf16.msra.mxu1 %v1792_v17  ;;  %v1830_v9 = vld [vmem:[#allocation6 + $0x20] sm:$0xff]  }
  0x5a   : > { %1637 = vmatprep.subr.bf16.mxu0 %v1977_v0  ;;  %1657 = vmatprep.subr.bf16.mxu1 %v1977_v0 }
  0x5d   : > { %1638 = vmatpush3.bf16.msra.mxu0 %v1785_v11  ;;  %1658 = vmatpush3.bf16.msra.mxu1 %v1793_v18  ;;  %v851_v11 = vlaneseq }
  0x5e   : > { %1639 = vmatprep.subr.bf16.mxu0 %v1977_v0  ;;  %1659 = vmatprep.subr.bf16.mxu1 %v1977_v0 }
  0x5f   : > { %v852_v12 = vshrl.u32 %v851_v11, 7 }
  0x61   : > { %1640 = vmatpush3.bf16.msra.mxu0 %v1786_v13  ;;  %1660 = vmatpush3.bf16.msra.mxu1 %v1794_v19  ;;  %v853_v13 = vsub.s32 0, %v852_v12  ;;  %v857_v15 = vsub.s32 1, %v852_v12 }
  0x62   : > { %1665 = vmatprep.subr.bf16.mxu1 %v1977_v0  ;;  %941 = vmatprep.subr.bf16.mxu0 %v1797_v21 }
  0x63   : > { %v858_v17 = vrot.slane %v849_v14, %v857_v15 }
  0x64   : > { %1642 = vmatmul.mubr.bf16.vlgmr.msra.gmra.mxu0 %v598_v16  ;;  %v854_v16 = vrot.slane %v849_v14, %v853_v13 }
  0x65   : > { %942 = vmatpush1.bf16.msra.mxu0 %v1795_v20  ;;  %973 = vmatprep.mubr.bf16.mxu0 %v1979_v48 }
  0x66   : > { %943 = vmatprep.subr.bf16.mxu0 %v1800_v22 }
  0x69   : > { %944 = vmatpush1.bf16.msra.mxu0 %v1798_v23 }
  0x6a   : > { %945 = vmatprep.subr.bf16.mxu0 %v1803_v24 }
  0x6d   : > { %946 = vmatpush1.bf16.msra.mxu0 %v1801_v25 }
  0x6e   : > { %947 = vmatprep.subr.bf16.mxu0 %v1806_v26 }
  0x71   : > { %948 = vmatpush1.bf16.msra.mxu0 %v1804_v27 }
  0x72   : > { %949 = vmatprep.subr.bf16.mxu0 %v1809_v28 }
  0x75   : > { %950 = vmatpush1.bf16.msra.mxu0 %v1807_v29 }
  0x76   : > { %951 = vmatprep.subr.bf16.mxu0 %v1812_v42  ;;  %v1835_v42 = vld [vmem:[#allocation7 + $0x38] sm:$0xff]  }
  0x79   : > { %952 = vmatpush1.bf16.msra.mxu0 %v1810_v43  ;;  %v1836_v43 = vld [vmem:[#allocation7 + $0x30] sm:$0xff]  }
  0x7a   : > { %953 = vmatprep.subr.bf16.mxu0 %v1815_v44  ;;  %v1837_v44 = vld [vmem:[#allocation7 + $0x28] sm:$0xff]  }
  0x7d   : > { %954 = vmatpush1.bf16.msra.mxu0 %v1813_v45  ;;  %v1838_v45 = vld [vmem:[#allocation7 + $0x20] sm:$0xff]  }
  0x7e   : > { %955 = vmatprep.subr.bf16.mxu0 %v1818_v46  ;;  %v1839_v46 = vld [vmem:[#allocation7 + $0x18] sm:$0xff]  }
  0x81   : > { %956 = vmatpush1.bf16.msra.mxu0 %v1816_v47  ;;  %v1550_v47 = vld [vmem:[%s2338_s9] ss:$0 sm:$0xff] }
  0x82   : > { %1685 = vmatprep.subr.bf16.mxu0 %v1977_v0 }
 0x124   : > { %v704_v31 = vpop.f32.mrf.mxu0 }
 0x125   : > { %v705_v32 = vadd.f32 %v1516_v30, %v704_v31  ;;  %v988_v31 = vld [vmem:[%s580_s20] sm:$0xff] }
 0x126   : > { %v1643_v33 = vpop.f32.mrf.mxu0 }
 0x127   : > { %v711_v35 = vmul.f32 0.5, %v705_v32 }
 0x128   : > { %v707_v34 = vpop.f32.mrf.mxu0 }
 0x129   : > { %v708_v36 = vadd.f32 %v1516_v30, %v707_v34  ;;  %v713_v39 = vmax.f32 %v705_v32, %v711_v35  ;;  %v989_v32 = vld [vmem:[%s580_s20 + $0x8] sm:$0xff] }
 0x12a   : > { %v1644_v37 = vpop.f32.mrf.mxu0 }
 0x12b   : > { %v712_v38 = vmul.f32 0.5, %v708_v36 }
 0x12d   : > { %v714_v40 = vmax.f32 %v708_v36, %v712_v38 }
 0x12f   : > { %v715_v41 = vpack.c.bf16 %v714_v40, %v713_v39  ;;  %v1832_v39 = vld [vmem:[#allocation6 + $0x10] sm:$0xff]   ;;  %v1833_v40 = vld [vmem:[#allocation6 + $0x8] sm:$0xff]  }
 0x131   : > { %1662 = vmatmul.mubr.bf16.vlgmr.msra.gmra.mxu1 %v715_v41  ;;  %v1834_v41 = vld [vmem:[#allocation6] sm:$0xff]  }
 0x132   : > { %1681 = vmatprep.mubr.msk.bf16.mxu1 %vm1978_vm0, %v1977_v0  ;;  %1666 = vmatpush3.bf16.msra.mxu1 %v1819_v61  ;;  %v1842_v61 = vld [vmem:[#allocation7] sm:$0xff]  }
 0x133   : > { %1667 = vmatprep.subr.bf16.mxu1 %v1977_v0 }
 0x136   : > { %1668 = vmatpush3.bf16.msra.mxu1 %v1820_v62  ;;  %v1559_v62 = vld [vmem:[%s2340_s11] ss:$0 sm:$0xff] }
 0x137   : > { %1669 = vmatprep.subr.bf16.mxu1 %v1977_v0 }
 0x13a   : > { %1670 = vmatpush3.bf16.msra.mxu1 %v1821_v63 }
 0x13b   : > { %1671 = vmatprep.subr.bf16.mxu1 %v1977_v0 }
 0x13e   : > { %1672 = vmatpush3.bf16.msra.mxu1 %v1822_v1 }
 0x13f   : > { %1673 = vmatprep.subr.bf16.mxu1 %v1977_v0 }
 0x142   : > { %1674 = vmatpush3.bf16.msra.mxu1 %v1823_v2 }
 0x143   : > { %1675 = vmatprep.subr.bf16.mxu1 %v1977_v0 }
 0x146   : > { %1676 = vmatpush3.bf16.msra.mxu1 %v1824_v3 }
 0x147   : > { %1677 = vmatprep.subr.bf16.mxu1 %v1977_v0 }
 0x14a   : > { %1678 = vmatpush3.bf16.msra.mxu1 %v1825_v4 }
 0x14b   : > { %1679 = vmatprep.subr.bf16.mxu1 %v1977_v0 }
 0x14e   : > { %1680 = vmatpush3.bf16.msra.mxu1 %v1826_v5 }
 0x14f   : > { %1705 = vmatprep.subr.bf16.mxu1 %v1977_v0 }
 0x1f1   : > { %v821_v50 = vpop.f32.mrf.mxu1 }
 0x1f2   : > { %v822_v51 = vadd.f32 %v1525_v49, %v821_v50 }
 0x1f3   : > { %v1663_v52 = vpop.f32.mrf.mxu1 }
 0x1f4   : > { %v828_v54 = vmul.f32 0.5, %v822_v51 }
 0x1f5   : > { %v824_v53 = vpop.f32.mrf.mxu1 }
 0x1f6   : > { %v825_v55 = vadd.f32 %v1525_v49, %v824_v53  ;;  %v830_v58 = vmax.f32 %v822_v51, %v828_v54 }
 0x1f7   : > { %v1664_v56 = vpop.f32.mrf.mxu1 }
 0x1f8   : > { %v829_v57 = vmul.f32 0.5, %v825_v55 }
 0x1fa   : > { %v831_v59 = vmax.f32 %v825_v55, %v829_v57 }
 0x1fc   : > { %v832_v60 = vpack.c.bf16 %v831_v59, %v830_v58  ;;  %v1840_v59 = vld [vmem:[#allocation7 + $0x10] sm:$0xff]  }
 0x1fe   : > { %974 = vmatmul.mubr.bf16.vlgmr.msra.gmra.mxu0 %v832_v60  ;;  %v1841_v60 = vld [vmem:[#allocation7 + $0x8] sm:$0xff]  }
 0x1ff   : > { %1701 = vmatprep.mubr.msk.bf16.mxu0 %vm1978_vm0, %v1977_v0  ;;  %1686 = vmatpush3.bf16.msra.mxu0 %v1827_v6 }
 0x200   : > { %1687 = vmatprep.subr.bf16.mxu0 %v1977_v0 }
 0x203   : > { %1688 = vmatpush3.bf16.msra.mxu0 %v1828_v7 }
 0x204   : > { %1689 = vmatprep.subr.bf16.mxu0 %v1977_v0 }
 0x207   : > { %1690 = vmatpush3.bf16.msra.mxu0 %v1829_v8 }
 0x208   : > { %1691 = vmatprep.subr.bf16.mxu0 %v1977_v0 }
 0x20b   : > { %1692 = vmatpush3.bf16.msra.mxu0 %v1830_v9 }
 0x20c   : > { %1693 = vmatprep.subr.bf16.mxu0 %v1977_v0 }
 0x20f   : > { %1694 = vmatpush3.bf16.msra.mxu0 %v1831_v10 }
 0x210   : > { %1695 = vmatprep.subr.bf16.mxu0 %v1977_v0 }
 0x213   : > { %1696 = vmatpush3.bf16.msra.mxu0 %v1832_v39 }
 0x214   : > { %1697 = vmatprep.subr.bf16.mxu0 %v1977_v0 }
 0x217   : > { %1698 = vmatpush3.bf16.msra.mxu0 %v1833_v40 }
 0x218   : > { %1699 = vmatprep.subr.bf16.mxu0 %v1977_v0 }
 0x21b   : > { %1700 = vmatpush3.bf16.msra.mxu0 %v1834_v41 }
 0x2be   : > { %v975_v18 = vpop.f32.mrf.mxu0 }
 0x2bf   : > { %v976_v19 = vadd.f32 %v975_v18, %v854_v16 }
 0x2c0   : > { %v977_v20 = vpop.f32.mrf.mxu0 }
 0x2c1   : > { %984 = vst [vmem:[%s593_s21] sm:$0xff] %v976_v19  ;;  %v978_v21 = vadd.f32 %v977_v20, %v858_v17 }
 0x2c2   : > { %v979_v22 = vpop.f32.mrf.mxu0 }
 0x2c3   : > { %985 = vst [vmem:[%s593_s21 + $0x8] sm:$0xff] %v978_v21  ;;  %v990_v23 = vmul.f32 0.5, %v978_v21  ;;  %v980_v24 = vadd.f32 %v979_v22, %v854_v16 }
 0x2c4   : > { %v981_v25 = vpop.f32.mrf.mxu0 }
 0x2c5   : > { %v992_v26 = vmul.f32 1.442695, %v990_v23  ;;  %986 = vst [vmem:[%s593_s21 + $0x10] sm:$0xff] %v980_v24  ;;  %v982_v27 = vadd.f32 %v981_v25, %v858_v17 }
 0x2c7   : > { %1843 = vpow2.f32 %v992_v26  ;;  %987 = vst [vmem:[%s593_s21 + $0x18] sm:$0xff] %v982_v27  ;;  %v991_v28 = vmul.f32 0.5, %v982_v27 }
 0x2c9   : > { %v994_v29 = vmul.f32 1.442695, %v991_v28 }
 0x2cb   : > { %1845 = vpow2.f32 %v994_v29 }
 0x2d4   : > { %v1844_v30 = vpop.eup %1843 }
 0x2d5   : > { %v996_v33 = vmul.f32 %v1844_v30, %v988_v31 }
 0x2d7   : > { %v998_v36 = vadd.f32 %v996_v33, %v976_v19 }
 0x2d8   : > { %v1846_v34 = vpop.eup %1845 }
 0x2d9   : > { %v997_v35 = vmul.f32 %v1846_v34, %v989_v32 }
 0x2db   : > { %v999_v37 = vadd.f32 %v997_v35, %v980_v24 }
 0x2dd   : > { %v1000_v38 = vpack.c.bf16 %v999_v37, %v998_v36 }
 0x2df   : > { %1682 = vmatmul.mubr.bf16.vlgmr.msra.gmra.mxu1 %v1000_v38 }
 0x2e0   : > { %1721 = vmatprep.mubr.msk.bf16.mxu1 %vm1978_vm0, %v1977_v0  ;;  %1706 = vmatpush3.bf16.msra.mxu1 %v1835_v42 }
 0x2e1   : > { %1707 = vmatprep.subr.bf16.mxu1 %v1977_v0 }
 0x2e4   : > { %1708 = vmatpush3.bf16.msra.mxu1 %v1836_v43 }
 0x2e5   : > { %1709 = vmatprep.subr.bf16.mxu1 %v1977_v0 }
 0x2e8   : > { %1710 = vmatpush3.bf16.msra.mxu1 %v1837_v44 }
 0x2e9   : > { %1711 = vmatprep.subr.bf16.mxu1 %v1977_v0 }
 0x2ec   : > { %1712 = vmatpush3.bf16.msra.mxu1 %v1838_v45 }
 0x2ed   : > { %1713 = vmatprep.subr.bf16.mxu1 %v1977_v0 }
 0x2f0   : > { %1714 = vmatpush3.bf16.msra.mxu1 %v1839_v46 }
 0x2f1   : > { %1715 = vmatprep.subr.bf16.mxu1 %v1977_v0 }
 0x2f4   : > { %1716 = vmatpush3.bf16.msra.mxu1 %v1840_v59 }
 0x2f5   : > { %1717 = vmatprep.subr.bf16.mxu1 %v1977_v0 }
 0x2f8   : > { %1718 = vmatpush3.bf16.msra.mxu1 %v1841_v60 }
 0x2f9   : > { %1719 = vmatprep.subr.bf16.mxu1 %v1977_v0  ;;  %v1568_v0 = vld [vmem:[%s2342_s13] ss:$0 sm:$0xff] }
 0x2fc   : > { %1720 = vmatpush3.bf16.msra.mxu1 %v1842_v61 }
 0x39f   : > { %v1106_v48 = vpop.f32.mrf.mxu1 }
 0x3a0   : > { %v1107_v49 = vadd.f32 %v1550_v47, %v1106_v48 }
 0x3a1   : > { %v1683_v50 = vpop.f32.mrf.mxu1 }
 0x3a2   : > { %v1113_v52 = vmul.f32 0.5, %v1107_v49 }
 0x3a3   : > { %v1109_v51 = vpop.f32.mrf.mxu1 }
 0x3a4   : > { %v1110_v53 = vadd.f32 %v1550_v47, %v1109_v51  ;;  %v1115_v56 = vmax.f32 %v1107_v49, %v1113_v52 }
 0x3a5   : > { %v1684_v54 = vpop.f32.mrf.mxu1 }
 0x3a6   : > { %v1114_v55 = vmul.f32 0.5, %v1110_v53 }
 0x3a8   : > { %v1116_v57 = vmax.f32 %v1110_v53, %v1114_v55 }
 0x3aa   : > { %v1117_v58 = vpack.c.bf16 %v1116_v57, %v1115_v56 }
 0x3ac   : > { %1702 = vmatmul.mubr.bf16.vlgmr.msra.gmra.mxu0 %v1117_v58 }
 0x46c   : > { %v1223_v63 = vpop.f32.mrf.mxu0 }
 0x46d   : > { %v1224_v1 = vadd.f32 %v1559_v62, %v1223_v63 }
 0x46e   : > { %v1703_v2 = vpop.f32.mrf.mxu0 }
 0x46f   : > { %v1230_v4 = vmul.f32 0.5, %v1224_v1 }
 0x470   : > { %v1226_v3 = vpop.f32.mrf.mxu0 }
 0x471   : > { %v1227_v5 = vadd.f32 %v1559_v62, %v1226_v3  ;;  %v1232_v8 = vmax.f32 %v1224_v1, %v1230_v4 }
 0x472   : > { %v1704_v6 = vpop.f32.mrf.mxu0 }
 0x473   : > { %v1231_v7 = vmul.f32 0.5, %v1227_v5 }
 0x475   : > { %v1233_v9 = vmax.f32 %v1227_v5, %v1231_v7 }
 0x477   : > { %v1234_v10 = vpack.c.bf16 %v1233_v9, %v1232_v8 }
 0x479   : > { %1722 = vmatmul.mubr.bf16.vlgmr.msra.gmra.mxu1 %v1234_v10 }
 0x539   : > { %v1340_v11 = vpop.f32.mrf.mxu1 }
 0x53a   : > { %v1341_v12 = vadd.f32 %v1568_v0, %v1340_v11 }
 0x53b   : > { %v1723_v13 = vpop.f32.mrf.mxu1 }
 0x53c   : > { %1347 = vst [vmem:[%s586_s16] sm:$0xff] %v1341_v12 }
 0x53d   : > { %v1343_v14 = vpop.f32.mrf.mxu1 }
 0x53e   : > { %v1344_v15 = vadd.f32 %v1568_v0, %v1343_v14 }
 0x53f   : > { %v1724_v16 = vpop.f32.mrf.mxu1 }
 0x540   : > { %1348 = vst [vmem:[%s586_s16 + $0x8] sm:$0xff] %v1344_v15 }
 0x541 PF: > { %s29_s18 = sadd.s32 1, %s1969_s18  }
 0x542   : > { %p26_p3 = scmp.ge.s32.totalorder %s29_s18, 4  }
 0x544   :  { %28 = sbr.rel (!%p26_p3) target bundleno = 3 (0x3), region = 138 }
 0x549   :  { %1390 = vsyncpa [#allocation3], 1 }
 0x54a   :  { %1392 = vsyncpa [#allocation3 + $0x1], 1 }
 0x54b   :  { %1393 = vsyncpa [#allocation5], 1 }
 0x54c   :  { %1394 = vsyncpa [#allocation8], 1 }

</bundles_post_ra>
